<compile_context>
chip_gen: v5e
topology: v5e:2x2
jax: 0.10.0
libtpu: 0.0.40
codegen_flags: <defaults>
</compile_context>

<pallas_src>
import functools

import jax
import jax.numpy as jnp
from jax.experimental import pallas as pl
from jax.experimental.pallas import tpu as pltpu

INPUT_SIZE = 3 * 3  # = 9, as in the reference module
H1, H2, H3 = 256, 128, 64
DEFAULT_BLOCK_B = 1024  # batch-tile rows (multiple of 16; ~a few MB of VMEM/tile)


def _round_up(n, m):
    return ((n + m - 1) // m) * m


def mlp_kernel(x_ref, w1_ref, b1_ref, w2_ref, b2_ref, w3_ref, b3_ref,
               w4_ref, b4_ref, o_ref):
    # fc1 + relu : bf16 MXU inputs, f32 accumulation, epilogue on the f32 acc.
    h = jnp.dot(x_ref[...], w1_ref[...], preferred_element_type=jnp.float32)
    h = jnp.maximum(h + b1_ref[...], 0.0).astype(jnp.bfloat16)
    # fc2 + relu
    h = jnp.dot(h, w2_ref[...], preferred_element_type=jnp.float32)
    h = jnp.maximum(h + b2_ref[...], 0.0).astype(jnp.bfloat16)
    # fc3 + relu
    h = jnp.dot(h, w3_ref[...], preferred_element_type=jnp.float32)
    h = jnp.maximum(h + b3_ref[...], 0.0).astype(jnp.bfloat16)
    # fc4 (no activation)
    h = jnp.dot(h, w4_ref[...], preferred_element_type=jnp.float32)
    o_ref[...] = (h + b4_ref[...]).astype(o_ref.dtype)


@functools.partial(jax.jit, static_argnames=("block_b",))
def stress_strain_fcn(x, params, block_b=DEFAULT_BLOCK_B):
    """x: (B, 3, 3) or (B, 9) float32.  Returns (B, 9) float32."""
    b = x.shape[0]
    x2d = x.reshape(b, -1).astype(jnp.bfloat16)

    w1, b1, w2, b2, w3, b3, w4, b4 = params
    # Weights in bf16 (halved HBM traffic, full-rate MXU); biases stay f32.
    w1, w2, w3, w4 = (w.astype(jnp.bfloat16) for w in (w1, w2, w3, w4))

    # Batch tile: multiple of 16 (bf16 sublane packing), capped at block_b.
    tb = min(_round_up(block_b, 16), _round_up(b, 16))
    b_pad = _round_up(b, tb)
    if b_pad != b:
        x2d = jnp.pad(x2d, ((0, b_pad - b), (0, 0)))
    grid = (b_pad // tb,)

    def resident(i):           # weights/biases: same block every grid step
        return (0, 0)

    def batch_tile(i):         # x / out: stream along the batch axis
        return (i, 0)

    in_specs = [
        pl.BlockSpec((tb, INPUT_SIZE), batch_tile),
        pl.BlockSpec(w1.shape, resident), pl.BlockSpec(b1.shape, resident),
        pl.BlockSpec(w2.shape, resident), pl.BlockSpec(b2.shape, resident),
        pl.BlockSpec(w3.shape, resident), pl.BlockSpec(b3.shape, resident),
        pl.BlockSpec(w4.shape, resident), pl.BlockSpec(b4.shape, resident),
    ]
    out_specs = pl.BlockSpec((tb, INPUT_SIZE), batch_tile)

    flops = 2 * b_pad * (INPUT_SIZE * H1 + H1 * H2 + H2 * H3 + H3 * INPUT_SIZE)
    param_bytes = sum(int(a.size) * a.dtype.itemsize
                      for a in (w1, b1, w2, b2, w3, b3, w4, b4))
    bytes_accessed = (b_pad * INPUT_SIZE * 2        # bf16 input stream
                      + b_pad * INPUT_SIZE * 4      # f32 output stream
                      + param_bytes)

    out = pl.pallas_call(
        mlp_kernel,
        out_shape=jax.ShapeDtypeStruct((b_pad, INPUT_SIZE), jnp.float32),
        grid=grid,
        in_specs=in_specs,
        out_specs=out_specs,
        compiler_params=pltpu.CompilerParams(
            dimension_semantics=("parallel",),
            vmem_limit_bytes=64 * 1024 * 1024,
        ),
        cost_estimate=pl.CostEstimate(
            flops=flops, bytes_accessed=bytes_accessed, transcendentals=0),
    )(x2d, w1, b1, w2, b2, w3, b3, w4, b4)
    return out[:b]


def init_params(key):
    """Deterministic init mimicking PyTorch Linear default (uniform ±1/sqrt(fan_in))."""
    dims = [(INPUT_SIZE, H1), (H1, H2), (H2, H3), (H3, INPUT_SIZE)]
    params = []
    for (fan_in, fan_out) in dims:
        key, kw, kb = jax.random.split(key, 3)
        bound = 1.0 / jnp.sqrt(float(fan_in))
        w = jax.random.uniform(kw, (fan_in, fan_out), jnp.float32, -bound, bound)
        bias = jax.random.uniform(kb, (1, fan_out), jnp.float32, -bound, bound)
        params.extend([w, bias])
    return tuple(params)


def reference_forward(x, params):
    """Pure-JAX reference using the same bf16-in / f32-accumulate precision path."""
    b = x.shape[0]
    h = x.reshape(b, -1).astype(jnp.bfloat16)
    w1, b1, w2, b2, w3, b3, w4, b4 = params

    def lin(h, w, bias):
        return jnp.dot(h, w.astype(jnp.bfloat16),
                       preferred_element_type=jnp.float32) + bias

    h = jnp.maximum(lin(h, w1, b1), 0.0).astype(jnp.bfloat16)
    h = jnp.maximum(lin(h, w2, b2), 0.0).astype(jnp.bfloat16)
    h = jnp.maximum(lin(h, w3, b3), 0.0).astype(jnp.bfloat16)
    return lin(h, w4, b4)


if __name__ == "__main__":
    key = jax.random.PRNGKey(0)
    key, kx1, kx2 = jax.random.split(key, 3)
    params = init_params(key)

    # Small primary test (batch=2), single grid step with padding to the tile.
    x_small = jax.random.normal(kx1, (2, 3, 3), jnp.float32)
    out_small = jax.block_until_ready(stress_strain_fcn(x_small, params))
    ref_small = reference_forward(x_small, params)
    assert out_small.shape == (2, INPUT_SIZE)
    assert jnp.allclose(out_small, ref_small, atol=1e-2, rtol=1e-2)

    # Multi-tile test (ragged batch, several grid steps) to exercise the pipeline.
    x_big = jax.random.normal(kx2, (40, 3, 3), jnp.float32)
    out_big = jax.block_until_ready(stress_strain_fcn(x_big, params, block_b=16))
    ref_big = reference_forward(x_big, params)
    assert out_big.shape == (40, INPUT_SIZE)
    assert jnp.allclose(out_big, ref_big, atol=1e-2, rtol=1e-2)

    print("KERNEL_OK")
</pallas_src>

<mosaic_0001>
module attributes {stable_mosaic.version = 11 : i64} {
  func.func @mlp_kernel(%arg0: i32, %arg1: memref<16x9xbf16, #tpu.memory_space<vmem>>, %arg2: memref<9x256xbf16, #tpu.memory_space<vmem>>, %arg3: memref<1x256xf32, #tpu.memory_space<vmem>>, %arg4: memref<256x128xbf16, #tpu.memory_space<vmem>>, %arg5: memref<1x128xf32, #tpu.memory_space<vmem>>, %arg6: memref<128x64xbf16, #tpu.memory_space<vmem>>, %arg7: memref<1x64xf32, #tpu.memory_space<vmem>>, %arg8: memref<64x9xbf16, #tpu.memory_space<vmem>>, %arg9: memref<1x9xf32, #tpu.memory_space<vmem>>, %arg10: memref<16x9xf32, #tpu.memory_space<vmem>>) attributes {dimension_semantics = [#tpu.dimension_semantics<parallel>], iteration_bounds = array<i64: 1>, scalar_prefetch = 0 : i64, scratch_operands = 0 : i64, tpu.core_type = #tpu.core_type<tc>, window_params = [{transform_indices = @transform_0, window_bounds = array<i64: 16, 9>}, {pipeline_mode = #tpu.pipeline_mode<synchronous>, transform_indices = @transform_1, window_bounds = array<i64: 9, 256>}, {pipeline_mode = #tpu.pipeline_mode<synchronous>, transform_indices = @transform_2, window_bounds = array<i64: 1, 256>}, {pipeline_mode = #tpu.pipeline_mode<synchronous>, transform_indices = @transform_3, window_bounds = array<i64: 256, 128>}, {pipeline_mode = #tpu.pipeline_mode<synchronous>, transform_indices = @transform_4, window_bounds = array<i64: 1, 128>}, {pipeline_mode = #tpu.pipeline_mode<synchronous>, transform_indices = @transform_5, window_bounds = array<i64: 128, 64>}, {pipeline_mode = #tpu.pipeline_mode<synchronous>, transform_indices = @transform_6, window_bounds = array<i64: 1, 64>}, {pipeline_mode = #tpu.pipeline_mode<synchronous>, transform_indices = @transform_7, window_bounds = array<i64: 64, 9>}, {pipeline_mode = #tpu.pipeline_mode<synchronous>, transform_indices = @transform_8, window_bounds = array<i64: 1, 9>}, {transform_indices = @transform_9, window_bounds = array<i64: 16, 9>}]} {
    %c0 = arith.constant 0 : index
    %c0_0 = arith.constant 0 : index
    %0 = vector.load %arg1[%c0, %c0_0] : memref<16x9xbf16, #tpu.memory_space<vmem>>, vector<16x9xbf16>
    %c0_1 = arith.constant 0 : index
    %c0_2 = arith.constant 0 : index
    %1 = vector.load %arg2[%c0_1, %c0_2] : memref<9x256xbf16, #tpu.memory_space<vmem>>, vector<9x256xbf16>
    %cst = arith.constant dense<0.000000e+00> : vector<16x256xf32>
    %2 = tpu.matmul %0, %1, %cst {dimension_numbers = #tpu.dot_dimension_numbers<[1], [0], [0], [1], [0, 0, 1, 1], [], []>} : vector<16x9xbf16>, vector<9x256xbf16>, vector<16x256xf32> -> vector<16x256xf32>
    %c0_3 = arith.constant 0 : index
    %c0_4 = arith.constant 0 : index
    %3 = vector.load %arg3[%c0_3, %c0_4] : memref<1x256xf32, #tpu.memory_space<vmem>>, vector<1x256xf32>
    %4 = vector.broadcast %3 : vector<1x256xf32> to vector<16x256xf32>
    %5 = arith.addf %2, %4 : vector<16x256xf32>
    %cst_5 = arith.constant 0.000000e+00 : f32
    %6 = vector.broadcast %cst_5 : f32 to vector<16x256xf32>
    %7 = arith.maximumf %5, %6 : vector<16x256xf32>
    %8 = arith.truncf %7 : vector<16x256xf32> to vector<16x256xbf16>
    %c0_6 = arith.constant 0 : index
    %c0_7 = arith.constant 0 : index
    %9 = vector.load %arg4[%c0_6, %c0_7] : memref<256x128xbf16, #tpu.memory_space<vmem>>, vector<256x128xbf16>
    %cst_8 = arith.constant dense<0.000000e+00> : vector<16x128xf32>
    %10 = tpu.matmul %8, %9, %cst_8 {dimension_numbers = #tpu.dot_dimension_numbers<[1], [0], [0], [1], [0, 0, 1, 1], [], []>} : vector<16x256xbf16>, vector<256x128xbf16>, vector<16x128xf32> -> vector<16x128xf32>
    %c0_9 = arith.constant 0 : index
    %c0_10 = arith.constant 0 : index
    %11 = vector.load %arg5[%c0_9, %c0_10] : memref<1x128xf32, #tpu.memory_space<vmem>>, vector<1x128xf32>
    %12 = vector.broadcast %11 : vector<1x128xf32> to vector<16x128xf32>
    %13 = arith.addf %10, %12 : vector<16x128xf32>
    %cst_11 = arith.constant 0.000000e+00 : f32
    %14 = vector.broadcast %cst_11 : f32 to vector<16x128xf32>
    %15 = arith.maximumf %13, %14 : vector<16x128xf32>
    %16 = arith.truncf %15 : vector<16x128xf32> to vector<16x128xbf16>
    %c0_12 = arith.constant 0 : index
    %c0_13 = arith.constant 0 : index
    %17 = vector.load %arg6[%c0_12, %c0_13] : memref<128x64xbf16, #tpu.memory_space<vmem>>, vector<128x64xbf16>
    %cst_14 = arith.constant dense<0.000000e+00> : vector<16x64xf32>
    %18 = tpu.matmul %16, %17, %cst_14 {dimension_numbers = #tpu.dot_dimension_numbers<[1], [0], [0], [1], [0, 0, 1, 1], [], []>} : vector<16x128xbf16>, vector<128x64xbf16>, vector<16x64xf32> -> vector<16x64xf32>
    %c0_15 = arith.constant 0 : index
    %c0_16 = arith.constant 0 : index
    %19 = vector.load %arg7[%c0_15, %c0_16] : memref<1x64xf32, #tpu.memory_space<vmem>>, vector<1x64xf32>
    %20 = vector.broadcast %19 : vector<1x64xf32> to vector<16x64xf32>
    %21 = arith.addf %18, %20 : vector<16x64xf32>
    %cst_17 = arith.constant 0.000000e+00 : f32
    %22 = vector.broadcast %cst_17 : f32 to vector<16x64xf32>
    %23 = arith.maximumf %21, %22 : vector<16x64xf32>
    %24 = arith.truncf %23 : vector<16x64xf32> to vector<16x64xbf16>
    %c0_18 = arith.constant 0 : index
    %c0_19 = arith.constant 0 : index
    %25 = vector.load %arg8[%c0_18, %c0_19] : memref<64x9xbf16, #tpu.memory_space<vmem>>, vector<64x9xbf16>
    %cst_20 = arith.constant dense<0.000000e+00> : vector<16x9xf32>
    %26 = tpu.matmul %24, %25, %cst_20 {dimension_numbers = #tpu.dot_dimension_numbers<[1], [0], [0], [1], [0, 0, 1, 1], [], []>} : vector<16x64xbf16>, vector<64x9xbf16>, vector<16x9xf32> -> vector<16x9xf32>
    %c0_21 = arith.constant 0 : index
    %c0_22 = arith.constant 0 : index
    %27 = vector.load %arg9[%c0_21, %c0_22] : memref<1x9xf32, #tpu.memory_space<vmem>>, vector<1x9xf32>
    %28 = vector.broadcast %27 : vector<1x9xf32> to vector<16x9xf32>
    %29 = arith.addf %26, %28 : vector<16x9xf32>
    %c0_23 = arith.constant 0 : index
    %c0_24 = arith.constant 0 : index
    %30 = vector.load %arg10[%c0_23, %c0_24] : memref<16x9xf32, #tpu.memory_space<vmem>>, vector<16x9xf32>
    tpu.vector_store %arg10[%c0_23, %c0_24], %29 {strides = array<i32>} : memref<16x9xf32, #tpu.memory_space<vmem>>, vector<16x9xf32>,
    return
  }
  func.func @transform_0(%arg0: i32) -> (i32, i32) {
    %c0_i32 = arith.constant 0 : i32
    %c0_i32_0 = arith.constant 0 : i32
    return %arg0, %c0_i32 : i32, i32
  }
  func.func @transform_1(%arg0: i32) -> (i32, i32) {
    %c0_i32 = arith.constant 0 : i32
    %c0_i32_0 = arith.constant 0 : i32
    %c0_i32_1 = arith.constant 0 : i32
    return %c0_i32, %c0_i32_0 : i32, i32
  }
  func.func @transform_2(%arg0: i32) -> (i32, i32) {
    %c0_i32 = arith.constant 0 : i32
    %c0_i32_0 = arith.constant 0 : i32
    %c0_i32_1 = arith.constant 0 : i32
    return %c0_i32, %c0_i32_0 : i32, i32
  }
  func.func @transform_3(%arg0: i32) -> (i32, i32) {
    %c0_i32 = arith.constant 0 : i32
    %c0_i32_0 = arith.constant 0 : i32
    %c0_i32_1 = arith.constant 0 : i32
    return %c0_i32, %c0_i32_0 : i32, i32
  }
  func.func @transform_4(%arg0: i32) -> (i32, i32) {
    %c0_i32 = arith.constant 0 : i32
    %c0_i32_0 = arith.constant 0 : i32
    %c0_i32_1 = arith.constant 0 : i32
    return %c0_i32, %c0_i32_0 : i32, i32
  }
  func.func @transform_5(%arg0: i32) -> (i32, i32) {
    %c0_i32 = arith.constant 0 : i32
    %c0_i32_0 = arith.constant 0 : i32
    %c0_i32_1 = arith.constant 0 : i32
    return %c0_i32, %c0_i32_0 : i32, i32
  }
  func.func @transform_6(%arg0: i32) -> (i32, i32) {
    %c0_i32 = arith.constant 0 : i32
    %c0_i32_0 = arith.constant 0 : i32
    %c0_i32_1 = arith.constant 0 : i32
    return %c0_i32, %c0_i32_0 : i32, i32
  }
  func.func @transform_7(%arg0: i32) -> (i32, i32) {
    %c0_i32 = arith.constant 0 : i32
    %c0_i32_0 = arith.constant 0 : i32
    %c0_i32_1 = arith.constant 0 : i32
    return %c0_i32, %c0_i32_0 : i32, i32
  }
  func.func @transform_8(%arg0: i32) -> (i32, i32) {
    %c0_i32 = arith.constant 0 : i32
    %c0_i32_0 = arith.constant 0 : i32
    %c0_i32_1 = arith.constant 0 : i32
    return %c0_i32, %c0_i32_0 : i32, i32
  }
  func.func @transform_9(%arg0: i32) -> (i32, i32) {
    %c0_i32 = arith.constant 0 : i32
    %c0_i32_0 = arith.constant 0 : i32
    return %arg0, %c0_i32 : i32, i32
  }
}

</mosaic_0001>

<bundles_post_ra>
// kernel: stress_strain_fcn.1
= control target key start
LH: loop header
LB: loop body
LE: loop exit
PB: predicated region body
PF: predicated region fallthrough
CT: control target
= control target key end

     0   :  { %vm60_vm0 = vcmask 1043456   ;;  %vm61_vm1 = vcmask 1044480   ;;  %v574_v2 = vmov 65535   ;;  %vm56_vm2 = vcmask 72704   ;;  %s746_s1 = inlined_call_operand.vmem [shape: bf16[9,256], index: 1, kind: input, shape index: {}]   ;;  %s747_s3 = inlined_call_operand.vmem [shape: bf16[256,128], index: 3, kind: input, shape index: {}]   ;;  %s748_s0 = inlined_call_operand.vmem [shape: bf16[16,9], index: 0, kind: input, shape index: {}]   ;;  %s749_s4 = inlined_call_operand.vmem [shape: f32[1,128], index: 4, kind: input, shape index: {}]   ;;  %s750_s5 = inlined_call_operand.vmem [shape: bf16[128,64], index: 5, kind: input, shape index: {}]   ;;  %s751_s2 = inlined_call_operand.vmem [shape: f32[1,256], index: 2, kind: input, shape index: {}]   ;;  %s752_s6 = inlined_call_operand.vmem [shape: f32[1,64], index: 6, kind: input, shape index: {}]   ;;  %s753_s7 = inlined_call_operand.vmem [shape: bf16[64,9], index: 7, kind: input, shape index: {}]   ;;  %s754_s8 = inlined_call_operand.vmem [shape: f32[1,9], index: 8, kind: input, shape index: {}]   ;;  %s755_s9 = inlined_call_operand.vmem [shape: f32[16,9], index: 9, kind: output, shape index: {}]  }
   0x1   :  { %v418_v0 = vld [vmem:[%s746_s1] sm:$0xf]  ;;  %v541_v1 = vld [vmem:[%s746_s1 + $0x4] sm:$0x10]  ;;  %v62_v3 = vsel %vm60_vm0, 4294967295, %v574_v2  ;;  %v549_v8 = vld [vmem:[%s747_s3 + $0x38] sm:$0xff] }
   0x2   :  { %v419_v4 = vor.u32 %v541_v1, %v418_v0  ;;  %v63_v5 = vsel %vm61_vm1, %v62_v3, 0  ;;  %v540_v6 = vld [vmem:[%s746_s1 + $0x4] sm:$0xf]  ;;  %v420_v7 = vld [vmem:[%s746_s1 + $0x8] sm:$0x10]  ;;  %v557_v10 = vld [vmem:[%s747_s3 + $0x78] sm:$0xff]  ;;  %236 = vmatpush.bf16.msra.mxu2 %v549_v8 }
   0x3   :  { %v423_v9 = vor.u32 %v540_v6, %v420_v7  ;;  %v548_v12 = vld [vmem:[%s747_s3 + $0x30] sm:$0xff]  ;;  %v539_v14 = vld [vmem:[%s748_s0] sm:$0xff]  ;;  %250 = vmatpush.bf16.msra.mxu3 %v557_v10  ;;  %v547_v16 = vld [vmem:[%s747_s3 + $0x28] sm:$0xff]  ;;  %vm388_vm3 = vcmask 523264  }
   0x4   :  { %v65_v11 = vand.u32 %v419_v4, %v63_v5  ;;  %v556_v15 = vld [vmem:[%s747_s3 + $0x70] sm:$0xff]  ;;  %v555_v17 = vld [vmem:[%s747_s3 + $0x68] sm:$0xff]  ;;  %v546_v18 = vld [vmem:[%s747_s3 + $0x20] sm:$0xff] }
   0x5   :  { %v68_v13 = vand.u32 %v423_v9, %v63_v5  ;;  %v554_v19 = vld [vmem:[%s747_s3 + $0x60] sm:$0xff]  ;;  %v545_v20 = vld [vmem:[%s747_s3 + $0x18] sm:$0xff]  ;;  %v544_v22 = vld [vmem:[%s747_s3 + $0x10] sm:$0xff] }
   0x6   :  { %77 = vmatpush.bf16.msra.mxu0 %v65_v11  ;;  %237 = vmatpush.bf16.msra.mxu2 %v548_v12  ;;  %v553_v21 = vld [vmem:[%s747_s3 + $0x58] sm:$0xff]  ;;  %v552_v23 = vld [vmem:[%s747_s3 + $0x50] sm:$0xff]  ;;  %v543_v24 = vld [vmem:[%s747_s3 + $0x8] sm:$0xff] }
   0x7   :  { %91 = vmatpush.bf16.msra.mxu1 %v68_v13  ;;  %251 = vmatpush.bf16.msra.mxu3 %v556_v15  ;;  %v551_v25 = vld [vmem:[%s747_s3 + $0x48] sm:$0xff]  ;;  %v542_v26 = vld [vmem:[%s747_s3] sm:$0xff]  ;;  %v565_v28 = vld [vmem:[%s750_s5 + $0x38] sm:$0xff] }
   0x8   :  { %v550_v27 = vld [vmem:[%s747_s3 + $0x40] sm:$0xff]  ;;  %v564_v29 = vld [vmem:[%s750_s5 + $0x30] sm:$0xff]  ;;  %v563_v30 = vld [vmem:[%s750_s5 + $0x28] sm:$0xff] }
   0x9   :  { %424 = vmatmul.msk.bf16.vlgmr.msra.gmra.mxu0 %vm56_vm2, %v539_v14  ;;  %v562_v31 = vld [vmem:[%s750_s5 + $0x20] sm:$0xff]  ;;  %v561_v49 = vld [vmem:[%s750_s5 + $0x18] sm:$0xff]  ;;  %v560_v50 = vld [vmem:[%s750_s5 + $0x10] sm:$0xff] }
   0xa   :  { %425 = vmatmul.msk.bf16.vlgmr.msra.gmra.mxu1 %vm56_vm2, %v539_v14  ;;  %238 = vmatpush.bf16.msra.mxu2 %v547_v16  ;;  %v37_v32 = vld [vmem:[%s751_s2] sm:$0x3]  ;;  %v559_v51 = vld [vmem:[%s750_s5 + $0x8] sm:$0xff]  ;;  %v569_v53 = vld [vmem:[%s753_s7 + $0x18] sm:$0xff] }
   0xb   :  { %252 = vmatpush.bf16.msra.mxu3 %v555_v17  ;;  %335 = vmatpush.bf16.msrb.mxu0 %v565_v28  ;;  %v39_v35 = vperm.slane %v37_v32, 0  ;;  %v40_v36 = vperm.slane %v37_v32, 1  ;;  %v558_v52 = vld [vmem:[%s750_s5] sm:$0xff]  ;;  %v568_v2 = vld [vmem:[%s753_s7 + $0x10] sm:$0xff]  ;;  %v567_v3 = vld [vmem:[%s753_s7 + $0x8] sm:$0xff] }
   0xc   :  { %396 = vmatpush.bf16.msrb.mxu1 %v569_v53  ;;  %v571_v55 = vld [vmem:[%s749_s4] ss:$0 sm:$0xff] }
   0xd   :  { %v566_v4 = vld [vmem:[%s753_s7] sm:$0xff] }
   0xe   :  { %239 = vmatpush.bf16.msra.mxu2 %v546_v18  ;;  %v572_v6 = vld [vmem:[%s752_s6] ss:$0 sm:$0xff] }
   0xf   :  { %253 = vmatpush.bf16.msra.mxu3 %v554_v19  ;;  %336 = vmatpush.bf16.msrb.mxu0 %v564_v29  ;;  %v573_v13 = vld [vmem:[%s754_s8] ss:$0 sm:$0xff] }
  0x10   :  { %397 = vmatpush.bf16.msrb.mxu1 %v568_v2 }
  0x12   :  { %240 = vmatpush.bf16.msra.mxu2 %v545_v20 }
  0x13   :  { %254 = vmatpush.bf16.msra.mxu3 %v553_v21  ;;  %337 = vmatpush.bf16.msrb.mxu0 %v563_v30 }
  0x14   :  { %398 = vmatpush.bf16.msrb.mxu1 %v567_v3 }
  0x16   :  { %241 = vmatpush.bf16.msra.mxu2 %v544_v22 }
  0x17   :  { %255 = vmatpush.bf16.msra.mxu3 %v552_v23  ;;  %338 = vmatpush.bf16.msrb.mxu0 %v562_v31 }
  0x18   :  { %399 = vmatpush.bf16.msrb.mxu1 %v566_v4 }
  0x1a   :  { %242 = vmatpush.bf16.msra.mxu2 %v543_v24 }
  0x1b   :  { %256 = vmatpush.bf16.msra.mxu3 %v551_v25  ;;  %339 = vmatpush.bf16.msrb.mxu0 %v561_v49 }
  0x1e   :  { %243 = vmatpush.bf16.msra.mxu2 %v542_v26 }
  0x1f   :  { %257 = vmatpush.bf16.msra.mxu3 %v550_v27  ;;  %340 = vmatpush.bf16.msrb.mxu0 %v560_v50 }
  0x23   :  { %341 = vmatpush.bf16.msrb.mxu0 %v559_v51 }
  0x27   :  { %342 = vmatpush.bf16.msrb.mxu0 %v558_v52 }
  0x86   :  { %v79_v33 = vpop.f32.mrf.mxu0 }
  0x87   :  { %v93_v34 = vpop.f32.mrf.mxu1  ;;  %v80_v37 = vadd.f32 %v79_v33, %v39_v35 }
  0x88   :  { %v94_v38 = vadd.f32 %v93_v34, %v40_v36 }
  0x89   :  { %v98_v43 = vmax.f32 %v80_v37, 0.0 }
  0x8a   :  { %v99_v45 = vmax.f32 %v94_v38, 0.0 }
  0x8e   :  { %v81_v39 = vpop.f32.mrf.mxu0 }
  0x8f   :  { %v82_v40 = vadd.f32 %v81_v39, %v39_v35  ;;  %v95_v41 = vpop.f32.mrf.mxu1 }
  0x90   :  { %v96_v42 = vadd.f32 %v95_v41, %v40_v36 }
  0x91   :  { %v100_v44 = vmax.f32 %v82_v40, 0.0 }
  0x92   :  { %v101_v46 = vmax.f32 %v96_v42, 0.0 }
  0x93   :  { %v102_v47 = vpack.c.bf16 %v100_v44, %v98_v43 }
  0x94   :  { %v103_v48 = vpack.c.bf16 %v101_v46, %v99_v45 }
  0x95   :  { %244 = vmatmul.bf16.vlgmr.msra.gmra.mxu2 %v102_v47 }
  0x96   :  { %258 = vmatmul.bf16.vlgmr.msra.gmra.mxu3 %v103_v48 }
 0x118   :  { %v245_v54 = vpop.f32.mrf.mxu2 }
 0x119   :  { %v259_v56 = vpop.f32.mrf.mxu3  ;;  %v246_v57 = vadd.f32 %v571_v55, %v245_v54 }
 0x11b   :  { %v260_v59 = vadd.f32 %v259_v56, %v246_v57 }
 0x11d   :  { %v264_v63 = vmax.f32 %v260_v59, 0.0 }
 0x120   :  { %v247_v58 = vpop.f32.mrf.mxu2 }
 0x121   :  { %v248_v60 = vadd.f32 %v571_v55, %v247_v58  ;;  %v261_v61 = vpop.f32.mrf.mxu3 }
 0x123   :  { %v262_v62 = vadd.f32 %v261_v61, %v248_v60 }
 0x125   :  { %v265_v0 = vmax.f32 %v262_v62, 0.0 }
 0x127   :  { %v266_v1 = vpack.c.bf16 %v265_v0, %v264_v63 }
 0x129   :  { %343 = vmatmul.bf16.vlgmr.msrb.gmra.mxu0 %v266_v1 }
 0x1a6   :  { %v344_v5 = vpop.f32.mrf.mxu0 }
 0x1a7   :  { %v345_v7 = vadd.f32 %v572_v6, %v344_v5 }
 0x1a9   :  { %v349_v10 = vmax.f32 %v345_v7, 0.0 }
 0x1ae   :  { %v346_v8 = vpop.f32.mrf.mxu0 }
 0x1af   :  { %v347_v9 = vadd.f32 %v572_v6, %v346_v8 }
 0x1b1   :  { %v350_v11 = vmax.f32 %v347_v9, 0.0 }
 0x1b3   :  { %v351_v12 = vpack.c.bf16 %v350_v11, %v349_v10 }
 0x1b5   :  { %538 = vmatmul.msk.bf16.vlgmr.msrb.gmra.mxu1 %vm388_vm3, %v351_v12 }
 0x232   :  { %v401_v14 = vpop.f32.mrf.mxu1 }
 0x233   :  { %v402_v15 = vadd.f32 %v573_v13, %v401_v14 }
 0x235   :  { %406 = vst.msk [vmem:[%s755_s9] sm:$0xff] %vm56_vm2, %v402_v15 }
 0x23a   :  { %v403_v16 = vpop.f32.mrf.mxu1 }
 0x23b   :  { %v404_v17 = vadd.f32 %v573_v13, %v403_v16 }
 0x23d   :  { %407 = vst.msk [vmem:[%s755_s9 + $0x8] sm:$0xff] %vm56_vm2, %v404_v17 }

</bundles_post_ra>
